<compile_context>
chip_gen: v7x
topology: tpu7x:2x2x1
jax: 0.10.0
libtpu: 0.0.40
codegen_flags: <defaults>
</compile_context>

<pallas_src>
import functools
import math

import jax
import jax.numpy as jnp
from jax import lax
from jax.experimental import pallas as pl
from jax.experimental.pallas import tpu as pltpu


# NOTE: precision=lax.Precision.HIGHEST can be added to the dots below for
# bit-level parity with an fp32 torch reference; default MXU precision is kept
# here (matches the previously validated kernels).
def _mm(a, b):
    """a @ b on the MXU with fp32 accumulation (2-D operands)."""
    return lax.dot_general(a, b, (((1,), (0,)), ((), ())),
                           preferred_element_type=jnp.float32)


def _mm_bt(a, b):
    """a @ b.T without materializing the transpose (contract last dims)."""
    return lax.dot_general(a, b, (((1,), (1,)), ((), ())),
                           preferred_element_type=jnp.float32)


# ----------------------------------------------------------------------------
# Single fused kernel: encoder + top-k pooling + coarsening + loss + decoder
# ----------------------------------------------------------------------------
def _fused_kernel(adj_ref, x0_ref, w1_ref, b1_ref, w2_ref, b2_ref,
                  w3_ref, b3_ref, w4_ref, b4_ref, w5_ref, b5_ref,
                  xrec_ref, adjout_ref, loss_ref,
                  *, k, inv_sqrt_h):
    adj = adj_ref[...]                                     # [N, N] (symmetric)
    n = adj.shape[0]
    hdim = w1_ref.shape[1]

    ones_n1 = jnp.ones((n, 1), jnp.float32)
    ones_1n = jnp.ones((1, n), jnp.float32)

    # --- symmetric GCN normalization, degree sums on the MXU -----------------
    #   agg(Z) = (D^-1/2 A D^-1/2) @ Z + (1/deg) * Z    (identity never built)
    deg_r = _mm(adj, ones_n1) + 1.0                        # [N, 1]
    deg_c = _mm(ones_1n, adj) + 1.0                        # [1, N]
    dr = lax.rsqrt(deg_r)
    dc = lax.rsqrt(deg_c)
    a_n = adj * dr * dc
    d_inv = dr * dr                                        # == dr*dc (A symmetric)

    def agg(z):
        return _mm(a_n, z) + d_inv * z

    # --- encoder: GCN1 + GCN2 (aggregate at the narrower width first) --------
    h = jnp.tanh(_mm(agg(x0_ref[...]), w1_ref[...]) + b1_ref[...])
    h = jnp.tanh(_mm(agg(h), w2_ref[...]) + b2_ref[...])   # x_enc  [N, H]

    # --- capsule seed scores: squared L2 norm, row+lane variants via MXU -----
    hh = h * h
    score_col = _mm(hh, jnp.ones((hdim, 1), jnp.float32))  # [N, 1]  score[i]
    score_row = _mm_bt(jnp.ones((1, hdim), jnp.float32), hh)  # [1, N] score[j]

    # --- in-kernel top-k: pairwise rank (identical ordering to lax.top_k) ----
    idx_i = lax.broadcasted_iota(jnp.int32, (n, n), 0)
    idx_j = lax.broadcasted_iota(jnp.int32, (n, n), 1)
    # beats[i, j] = 1  iff node i outranks node j (value desc, ties -> lower idx)
    beats = ((score_col > score_row) |
             ((score_col == score_row) & (idx_i < idx_j))).astype(jnp.float32)
    rank_row = _mm(ones_1n, beats)                         # [1, N] rank of each node
    rank_row = rank_row.astype(jnp.int32)                  # exact small ints

    # one-hot selection matrix: sel[r, j] = 1 iff rank_j == r   (r < K)
    r_iota = lax.broadcasted_iota(jnp.int32, (k, n), 0)
    sel = (rank_row == r_iota).astype(jnp.float32)         # [K, N]

    # seed gather as a one-hot MXU matmul (replaces K dynamic row copies)
    xs = _mm(sel, h)                                       # [K, H]

    # --- capsule assignment: S = softmax_row( Xs @ X^T / sqrt(H) ) -----------
    logits = _mm_bt(xs, h) * inv_sqrt_h                    # [K, N] (trans_b dot)
    m = jnp.max(logits, axis=-1, keepdims=True)            # XLU
    e = jnp.exp(logits - m)                                # EUP
    denom = _mm(e, ones_n1)                                # [K, 1] (MXU row-sum)
    s = e / denom                                          # [K, N]

    # --- coarsening -----------------------------------------------------------
    x_out = _mm(s, h)                                      # [K, H]
    adj_out = _mm(s, _mm_bt(adj, s))                       # S @ (A @ S^T) -> [K, K]
    adjout_ref[...] = adj_out

    # --- stability loss ||S S^T - I||_F^2 (no identity build) ----------------
    sst = _mm_bt(s, s)                                     # [K, K]
    loss_ref[0] = jnp.sum(sst * sst) - 2.0 * jnp.sum(s * s) + float(k)

    # --- decoder adjacency: dense_to_sparse drops weights -> binary adj ------
    # (softmax weights are strictly positive, so this is typically an almost
    #  complete K x K graph — this matches the torch dense_to_sparse behavior)
    dec_adj = (adj_out > 1e-9).astype(jnp.float32)         # [K, K] (symmetric)
    ones_k1 = jnp.ones((k, 1), jnp.float32)
    ones_1k = jnp.ones((1, k), jnp.float32)
    ddeg_r = _mm(dec_adj, ones_k1) + 1.0
    ddeg_c = _mm(ones_1k, dec_adj) + 1.0
    ddr = lax.rsqrt(ddeg_r)
    ddc = lax.rsqrt(ddeg_c)
    da_n = dec_adj * ddr * ddc
    dd_inv = ddr * ddr

    def dagg(z):
        return _mm(da_n, z) + dd_inv * z

    # --- decoder GCNs: H -> H -> H -> F (last layer projects first) ----------
    hd = jnp.tanh(dagg(_mm(x_out, w3_ref[...])) + b3_ref[...])
    hd = jnp.tanh(dagg(_mm(hd, w4_ref[...])) + b4_ref[...])
    hd = dagg(_mm(hd, w5_ref[...])) + b5_ref[...]
    xrec_ref[...] = hd


def fused_capsule_pool_ae(adj, nodes, params, k):
    n, f = nodes.shape
    hdim = params["w1"].shape[1]
    kern = functools.partial(_fused_kernel, k=k,
                             inv_sqrt_h=1.0 / math.sqrt(float(hdim)))
    x_rec, adj_out, loss = pl.pallas_call(
        kern,
        out_shape=(jax.ShapeDtypeStruct((k, f), jnp.float32),
                   jax.ShapeDtypeStruct((k, k), jnp.float32),
                   jax.ShapeDtypeStruct((1,), jnp.float32)),
        grid_spec=pltpu.PrefetchScalarGridSpec(
            num_scalar_prefetch=0,
            grid=(1,),
            in_specs=[
                pl.BlockSpec((n, n), lambda i: (0, 0)),        # adj
                pl.BlockSpec((n, f), lambda i: (0, 0)),        # nodes
                pl.BlockSpec((f, hdim), lambda i: (0, 0)),     # w1
                pl.BlockSpec((1, hdim), lambda i: (0, 0)),     # b1
                pl.BlockSpec((hdim, hdim), lambda i: (0, 0)),  # w2
                pl.BlockSpec((1, hdim), lambda i: (0, 0)),     # b2
                pl.BlockSpec((hdim, hdim), lambda i: (0, 0)),  # w3
                pl.BlockSpec((1, hdim), lambda i: (0, 0)),     # b3
                pl.BlockSpec((hdim, hdim), lambda i: (0, 0)),  # w4
                pl.BlockSpec((1, hdim), lambda i: (0, 0)),     # b4
                pl.BlockSpec((hdim, f), lambda i: (0, 0)),     # w5
                pl.BlockSpec((1, f), lambda i: (0, 0)),        # b5
            ],
            out_specs=(
                pl.BlockSpec((k, f), lambda i: (0, 0)),
                pl.BlockSpec((k, k), lambda i: (0, 0)),
                pl.BlockSpec(memory_space=pltpu.MemorySpace.SMEM),
            ),
        ),
        compiler_params=pltpu.CompilerParams(
            dimension_semantics=("arbitrary",),
            vmem_limit_bytes=32 * 1024 * 1024),
    )(adj, nodes,
      params["w1"], params["b1"].reshape(1, hdim),
      params["w2"], params["b2"].reshape(1, hdim),
      params["w3"], params["b3"].reshape(1, hdim),
      params["w4"], params["b4"].reshape(1, hdim),
      params["w5"], params["b5"].reshape(1, f))
    return x_rec, adj_out, loss[0]


# ----------------------------------------------------------------------------
# Plain-JAX glue (scatter build of the dense adjacency, params)
# ----------------------------------------------------------------------------
def to_dense_adj(edge_index, n):
    adj = jnp.zeros((n, n), jnp.float32)
    return adj.at[edge_index[0], edge_index[1]].set(1.0)


def glorot(key, shape):
    fan_in, fan_out = shape
    lim = math.sqrt(6.0 / (fan_in + fan_out))
    return jax.random.uniform(key, shape, jnp.float32, -lim, lim)


def init_params(key, num_features, nhid):
    ks = jax.random.split(key, 5)
    dims = [(num_features, nhid), (nhid, nhid), (nhid, nhid),
            (nhid, nhid), (nhid, num_features)]
    params = {}
    for i, (kk, d) in enumerate(zip(ks, dims), start=1):
        params[f"w{i}"] = glorot(kk, d)
        params[f"b{i}"] = jnp.zeros((d[1],), jnp.float32)
    return params


@functools.partial(jax.jit, static_argnames=("ratio",))
def capsule_pool_ae_forward(params, nodes, edge_index, batch, *, ratio=0.5):
    """Mirrors CapsulePool_AE.forward (single graph, recon_adj=True)."""
    del batch  # single graph
    n = nodes.shape[0]
    k = max(1, int(math.ceil(ratio * n)))

    adj = to_dense_adj(edge_index, n)     # edge-list scatter: plain JAX glue

    x_rec, adj_out, loss_stability = fused_capsule_pool_ae(adj, nodes, params, k)

    return x_rec, adj_out[None], loss_stability * 1e-05, 0


# ----------------------------------------------------------------------------
# Main
# ----------------------------------------------------------------------------
if __name__ == "__main__":
    key = jax.random.PRNGKey(0)
    k_nodes, k_params = jax.random.split(key)

    N, NUM_FEATURES, NHID, RATIO = 16, 8, 32, 0.5

    nodes = jax.random.normal(k_nodes, (N, NUM_FEATURES), dtype=jnp.float32)

    # Deterministic undirected ring + a few chords (both directions listed).
    src = jnp.arange(N, dtype=jnp.int32)
    dst = (src + 1) % N
    chord_src = jnp.arange(0, N, 4, dtype=jnp.int32)
    chord_dst = (chord_src + N // 2) % N
    edge_index = jnp.stack([
        jnp.concatenate([src, dst, chord_src, chord_dst]),
        jnp.concatenate([dst, src, chord_dst, chord_src]),
    ])
    batch = jnp.zeros((N,), jnp.int32)   # single graph

    params = init_params(k_params, NUM_FEATURES, NHID)

    x_recon, adj_out, loss_stab, zero = capsule_pool_ae_forward(
        params, nodes, edge_index, batch, ratio=RATIO)

    jax.block_until_ready((x_recon, adj_out, loss_stab))

    K = int(math.ceil(RATIO * N))
    assert x_recon.shape == (K, NUM_FEATURES)
    assert adj_out.shape == (1, K, K)
    assert jnp.all(jnp.isfinite(x_recon)) and jnp.all(jnp.isfinite(adj_out))
    assert jnp.isfinite(loss_stab)

    print("KERNEL_OK")
</pallas_src>

<mosaic_0001>
module attributes {stable_mosaic.version = 11 : i64} {
  func.func @_fused_kernel(%arg0: i32, %arg1: memref<16x16xf32, #tpu.memory_space<vmem>>, %arg2: memref<16x8xf32, #tpu.memory_space<vmem>>, %arg3: memref<8x32xf32, #tpu.memory_space<vmem>>, %arg4: memref<1x32xf32, #tpu.memory_space<vmem>>, %arg5: memref<32x32xf32, #tpu.memory_space<vmem>>, %arg6: memref<1x32xf32, #tpu.memory_space<vmem>>, %arg7: memref<32x32xf32, #tpu.memory_space<vmem>>, %arg8: memref<1x32xf32, #tpu.memory_space<vmem>>, %arg9: memref<32x32xf32, #tpu.memory_space<vmem>>, %arg10: memref<1x32xf32, #tpu.memory_space<vmem>>, %arg11: memref<32x8xf32, #tpu.memory_space<vmem>>, %arg12: memref<1x8xf32, #tpu.memory_space<vmem>>, %arg13: memref<8x8xf32, #tpu.memory_space<vmem>>, %arg14: memref<8x8xf32, #tpu.memory_space<vmem>>, %arg15: memref<1xf32, #tpu.memory_space<smem>>) attributes {dimension_semantics = [#tpu.dimension_semantics<arbitrary>], iteration_bounds = array<i64: 1>, scalar_prefetch = 0 : i64, scratch_operands = 0 : i64, tpu.core_type = #tpu.core_type<tc>, window_params = [{pipeline_mode = #tpu.pipeline_mode<synchronous>, transform_indices = @transform_0, window_bounds = array<i64: 16, 16>}, {pipeline_mode = #tpu.pipeline_mode<synchronous>, transform_indices = @transform_1, window_bounds = array<i64: 16, 8>}, {pipeline_mode = #tpu.pipeline_mode<synchronous>, transform_indices = @transform_2, window_bounds = array<i64: 8, 32>}, {pipeline_mode = #tpu.pipeline_mode<synchronous>, transform_indices = @transform_3, window_bounds = array<i64: 1, 32>}, {pipeline_mode = #tpu.pipeline_mode<synchronous>, transform_indices = @transform_4, window_bounds = array<i64: 32, 32>}, {pipeline_mode = #tpu.pipeline_mode<synchronous>, transform_indices = @transform_5, window_bounds = array<i64: 1, 32>}, {pipeline_mode = #tpu.pipeline_mode<synchronous>, transform_indices = @transform_6, window_bounds = array<i64: 32, 32>}, {pipeline_mode = #tpu.pipeline_mode<synchronous>, transform_indices = @transform_7, window_bounds = array<i64: 1, 32>}, {pipeline_mode = #tpu.pipeline_mode<synchronous>, transform_indices = @transform_8, window_bounds = array<i64: 32, 32>}, {pipeline_mode = #tpu.pipeline_mode<synchronous>, transform_indices = @transform_9, window_bounds = array<i64: 1, 32>}, {pipeline_mode = #tpu.pipeline_mode<synchronous>, transform_indices = @transform_10, window_bounds = array<i64: 32, 8>}, {pipeline_mode = #tpu.pipeline_mode<synchronous>, transform_indices = @transform_11, window_bounds = array<i64: 1, 8>}, {pipeline_mode = #tpu.pipeline_mode<synchronous>, transform_indices = @transform_12, window_bounds = array<i64: 8, 8>}, {pipeline_mode = #tpu.pipeline_mode<synchronous>, transform_indices = @transform_13, window_bounds = array<i64: 8, 8>}, {transform_indices = @transform_14, window_bounds = array<i64: 1>}]} {
    %c0 = arith.constant 0 : index
    %c0_0 = arith.constant 0 : index
    %0 = vector.load %arg1[%c0, %c0_0] : memref<16x16xf32, #tpu.memory_space<vmem>>, vector<16x16xf32>
    %cst = arith.constant 1.000000e+00 : f32
    %1 = vector.broadcast %cst : f32 to vector<16x1xf32>
    %cst_1 = arith.constant 1.000000e+00 : f32
    %2 = vector.broadcast %cst_1 : f32 to vector<1x16xf32>
    %cst_2 = arith.constant dense<0.000000e+00> : vector<16x1xf32>
    %3 = tpu.matmul %0, %1, %cst_2 {dimension_numbers = #tpu.dot_dimension_numbers<[1], [0], [0], [1], [0, 0, 1, 1], [], []>} : vector<16x16xf32>, vector<16x1xf32>, vector<16x1xf32> -> vector<16x1xf32>
    %cst_3 = arith.constant 1.000000e+00 : f32
    %4 = vector.broadcast %cst_3 : f32 to vector<16x1xf32>
    %5 = arith.addf %3, %4 : vector<16x1xf32>
    %cst_4 = arith.constant dense<0.000000e+00> : vector<1x16xf32>
    %6 = tpu.matmul %2, %0, %cst_4 {dimension_numbers = #tpu.dot_dimension_numbers<[1], [0], [0], [1], [0, 0, 1, 1], [], []>} : vector<1x16xf32>, vector<16x16xf32>, vector<1x16xf32> -> vector<1x16xf32>
    %cst_5 = arith.constant 1.000000e+00 : f32
    %7 = vector.broadcast %cst_5 : f32 to vector<1x16xf32>
    %8 = arith.addf %6, %7 : vector<1x16xf32>
    %9 = math.rsqrt %5 : vector<16x1xf32>
    %10 = math.rsqrt %8 : vector<1x16xf32>
    %11 = vector.broadcast %9 : vector<16x1xf32> to vector<16x16xf32>
    %12 = arith.mulf %0, %11 : vector<16x16xf32>
    %13 = vector.broadcast %10 : vector<1x16xf32> to vector<16x16xf32>
    %14 = arith.mulf %12, %13 : vector<16x16xf32>
    %15 = arith.mulf %9, %9 : vector<16x1xf32>
    %c0_6 = arith.constant 0 : index
    %c0_7 = arith.constant 0 : index
    %16 = vector.load %arg2[%c0_6, %c0_7] : memref<16x8xf32, #tpu.memory_space<vmem>>, vector<16x8xf32>
    %cst_8 = arith.constant dense<0.000000e+00> : vector<16x8xf32>
    %17 = tpu.matmul %14, %16, %cst_8 {dimension_numbers = #tpu.dot_dimension_numbers<[1], [0], [0], [1], [0, 0, 1, 1], [], []>} : vector<16x16xf32>, vector<16x8xf32>, vector<16x8xf32> -> vector<16x8xf32>
    %18 = vector.broadcast %15 : vector<16x1xf32> to vector<16x8xf32>
    %19 = arith.mulf %18, %16 : vector<16x8xf32>
    %20 = arith.addf %17, %19 : vector<16x8xf32>
    %c0_9 = arith.constant 0 : index
    %c0_10 = arith.constant 0 : index
    %21 = vector.load %arg3[%c0_9, %c0_10] : memref<8x32xf32, #tpu.memory_space<vmem>>, vector<8x32xf32>
    %cst_11 = arith.constant dense<0.000000e+00> : vector<16x32xf32>
    %22 = tpu.matmul %20, %21, %cst_11 {dimension_numbers = #tpu.dot_dimension_numbers<[1], [0], [0], [1], [0, 0, 1, 1], [], []>} : vector<16x8xf32>, vector<8x32xf32>, vector<16x32xf32> -> vector<16x32xf32>
    %c0_12 = arith.constant 0 : index
    %c0_13 = arith.constant 0 : index
    %23 = vector.load %arg4[%c0_12, %c0_13] : memref<1x32xf32, #tpu.memory_space<vmem>>, vector<1x32xf32>
    %24 = vector.broadcast %23 : vector<1x32xf32> to vector<16x32xf32>
    %25 = arith.addf %22, %24 : vector<16x32xf32>
    %26 = math.tanh %25 : vector<16x32xf32>
    %cst_14 = arith.constant dense<0.000000e+00> : vector<16x32xf32>
    %27 = tpu.matmul %14, %26, %cst_14 {dimension_numbers = #tpu.dot_dimension_numbers<[1], [0], [0], [1], [0, 0, 1, 1], [], []>} : vector<16x16xf32>, vector<16x32xf32>, vector<16x32xf32> -> vector<16x32xf32>
    %28 = vector.broadcast %15 : vector<16x1xf32> to vector<16x32xf32>
    %29 = arith.mulf %28, %26 : vector<16x32xf32>
    %30 = arith.addf %27, %29 : vector<16x32xf32>
    %c0_15 = arith.constant 0 : index
    %c0_16 = arith.constant 0 : index
    %31 = vector.load %arg5[%c0_15, %c0_16] : memref<32x32xf32, #tpu.memory_space<vmem>>, vector<32x32xf32>
    %cst_17 = arith.constant dense<0.000000e+00> : vector<16x32xf32>
    %32 = tpu.matmul %30, %31, %cst_17 {dimension_numbers = #tpu.dot_dimension_numbers<[1], [0], [0], [1], [0, 0, 1, 1], [], []>} : vector<16x32xf32>, vector<32x32xf32>, vector<16x32xf32> -> vector<16x32xf32>
    %c0_18 = arith.constant 0 : index
    %c0_19 = arith.constant 0 : index
    %33 = vector.load %arg6[%c0_18, %c0_19] : memref<1x32xf32, #tpu.memory_space<vmem>>, vector<1x32xf32>
    %34 = vector.broadcast %33 : vector<1x32xf32> to vector<16x32xf32>
    %35 = arith.addf %32, %34 : vector<16x32xf32>
    %36 = math.tanh %35 : vector<16x32xf32>
    %37 = arith.mulf %36, %36 : vector<16x32xf32>
    %cst_20 = arith.constant 1.000000e+00 : f32
    %38 = vector.broadcast %cst_20 : f32 to vector<32x1xf32>
    %cst_21 = arith.constant dense<0.000000e+00> : vector<16x1xf32>
    %39 = tpu.matmul %37, %38, %cst_21 {dimension_numbers = #tpu.dot_dimension_numbers<[1], [0], [0], [1], [0, 0, 1, 1], [], []>} : vector<16x32xf32>, vector<32x1xf32>, vector<16x1xf32> -> vector<16x1xf32>
    %cst_22 = arith.constant 1.000000e+00 : f32
    %40 = vector.broadcast %cst_22 : f32 to vector<1x32xf32>
    %cst_23 = arith.constant dense<0.000000e+00> : vector<1x16xf32>
    %41 = tpu.matmul %40, %37, %cst_23 {dimension_numbers = #tpu.dot_dimension_numbers<[1], [1], [0], [0], [0, 0, 1, 0], [], []>} : vector<1x32xf32>, vector<16x32xf32>, vector<1x16xf32> -> vector<1x16xf32>
    %42 = tpu.iota {dimensions = array<i32: 0>} : vector<16x16xi32>
    %43 = tpu.iota {dimensions = array<i32: 1>} : vector<16x16xi32>
    %44 = vector.broadcast %39 : vector<16x1xf32> to vector<16x16xf32>
    %45 = vector.broadcast %41 : vector<1x16xf32> to vector<16x16xf32>
    %46 = arith.cmpf ogt, %44, %45 : vector<16x16xf32>
    %47 = vector.broadcast %39 : vector<16x1xf32> to vector<16x16xf32>
    %48 = vector.broadcast %41 : vector<1x16xf32> to vector<16x16xf32>
    %49 = arith.cmpf oeq, %47, %48 : vector<16x16xf32>
    %50 = arith.cmpi slt, %42, %43 : vector<16x16xi32>
    %51 = arith.andi %49, %50 : vector<16x16xi1>
    %52 = arith.ori %46, %51 : vector<16x16xi1>
    %53 = arith.extui %52 : vector<16x16xi1> to vector<16x16xi32>
    %54 = arith.sitofp %53 : vector<16x16xi32> to vector<16x16xf32>
    %cst_24 = arith.constant dense<0.000000e+00> : vector<1x16xf32>
    %55 = tpu.matmul %2, %54, %cst_24 {dimension_numbers = #tpu.dot_dimension_numbers<[1], [0], [0], [1], [0, 0, 1, 1], [], []>} : vector<1x16xf32>, vector<16x16xf32>, vector<1x16xf32> -> vector<1x16xf32>
    %56 = arith.fptosi %55 : vector<1x16xf32> to vector<1x16xi32>
    %57 = tpu.iota {dimensions = array<i32: 0>} : vector<8x16xi32>
    %58 = vector.broadcast %56 : vector<1x16xi32> to vector<8x16xi32>
    %59 = arith.cmpi eq, %58, %57 : vector<8x16xi32>
    %60 = arith.extui %59 : vector<8x16xi1> to vector<8x16xi32>
    %61 = arith.sitofp %60 : vector<8x16xi32> to vector<8x16xf32>
    %cst_25 = arith.constant dense<0.000000e+00> : vector<8x32xf32>
    %62 = tpu.matmul %61, %36, %cst_25 {dimension_numbers = #tpu.dot_dimension_numbers<[1], [0], [0], [1], [0, 0, 1, 1], [], []>} : vector<8x16xf32>, vector<16x32xf32>, vector<8x32xf32> -> vector<8x32xf32>
    %cst_26 = arith.constant dense<0.000000e+00> : vector<8x16xf32>
    %63 = tpu.matmul %62, %36, %cst_26 {dimension_numbers = #tpu.dot_dimension_numbers<[1], [1], [0], [0], [0, 0, 1, 0], [], []>} : vector<8x32xf32>, vector<16x32xf32>, vector<8x16xf32> -> vector<8x16xf32>
    %cst_27 = arith.constant 0.176776692 : f32
    %64 = vector.broadcast %cst_27 : f32 to vector<8x16xf32>
    %65 = arith.mulf %63, %64 : vector<8x16xf32>
    %cst_28 = arith.constant dense<0xFF800000> : vector<8xf32>
    %66 = vector.multi_reduction <maximumf>, %65, %cst_28 [1] : vector<8x16xf32> to vector<8xf32>
    %67 = vector.shape_cast %66 : vector<8xf32> to vector<8x1xf32>
    %68 = vector.broadcast %67 : vector<8x1xf32> to vector<8x16xf32>
    %69 = arith.subf %65, %68 : vector<8x16xf32>
    %70 = math.exp %69 : vector<8x16xf32>
    %cst_29 = arith.constant dense<0.000000e+00> : vector<8x1xf32>
    %71 = tpu.matmul %70, %1, %cst_29 {dimension_numbers = #tpu.dot_dimension_numbers<[1], [0], [0], [1], [0, 0, 1, 1], [], []>} : vector<8x16xf32>, vector<16x1xf32>, vector<8x1xf32> -> vector<8x1xf32>
    %72 = vector.broadcast %71 : vector<8x1xf32> to vector<8x16xf32>
    %73 = arith.divf %70, %72 : vector<8x16xf32>
    %cst_30 = arith.constant dense<0.000000e+00> : vector<8x32xf32>
    %74 = tpu.matmul %73, %36, %cst_30 {dimension_numbers = #tpu.dot_dimension_numbers<[1], [0], [0], [1], [0, 0, 1, 1], [], []>} : vector<8x16xf32>, vector<16x32xf32>, vector<8x32xf32> -> vector<8x32xf32>
    %cst_31 = arith.constant dense<0.000000e+00> : vector<16x8xf32>
    %75 = tpu.matmul %0, %73, %cst_31 {dimension_numbers = #tpu.dot_dimension_numbers<[1], [1], [0], [0], [0, 0, 1, 0], [], []>} : vector<16x16xf32>, vector<8x16xf32>, vector<16x8xf32> -> vector<16x8xf32>
    %cst_32 = arith.constant dense<0.000000e+00> : vector<8x8xf32>
    %76 = tpu.matmul %73, %75, %cst_32 {dimension_numbers = #tpu.dot_dimension_numbers<[1], [0], [0], [1], [0, 0, 1, 1], [], []>} : vector<8x16xf32>, vector<16x8xf32>, vector<8x8xf32> -> vector<8x8xf32>
    %c0_33 = arith.constant 0 : index
    %c0_34 = arith.constant 0 : index
    %77 = vector.load %arg14[%c0_33, %c0_34] : memref<8x8xf32, #tpu.memory_space<vmem>>, vector<8x8xf32>
    tpu.vector_store %arg14[%c0_33, %c0_34], %76 {strides = array<i32>} : memref<8x8xf32, #tpu.memory_space<vmem>>, vector<8x8xf32>,
    %cst_35 = arith.constant dense<0.000000e+00> : vector<8x8xf32>
    %78 = tpu.matmul %73, %73, %cst_35 {dimension_numbers = #tpu.dot_dimension_numbers<[1], [1], [0], [0], [0, 0, 1, 0], [], []>} : vector<8x16xf32>, vector<8x16xf32>, vector<8x8xf32> -> vector<8x8xf32>
    %79 = arith.mulf %78, %78 : vector<8x8xf32>
    %80 = vector.shape_cast %79 : vector<8x8xf32> to vector<1x8x8xf32>
    %cst_36 = arith.constant dense<0.000000e+00> : vector<1xf32>
    %81 = vector.multi_reduction <add>, %80, %cst_36 [1, 2] : vector<1x8x8xf32> to vector<1xf32>
    %82 = vector.shape_cast %81 : vector<1xf32> to vector<1x1x1xf32>
    %83 = vector.extract %82[0, 0, 0] : f32 from vector<1x1x1xf32>
    %84 = arith.mulf %73, %73 : vector<8x16xf32>
    %85 = vector.shape_cast %84 : vector<8x16xf32> to vector<1x8x16xf32>
    %cst_37 = arith.constant dense<0.000000e+00> : vector<1xf32>
    %86 = vector.multi_reduction <add>, %85, %cst_37 [1, 2] : vector<1x8x16xf32> to vector<1xf32>
    %87 = vector.shape_cast %86 : vector<1xf32> to vector<1x1x1xf32>
    %88 = vector.extract %87[0, 0, 0] : f32 from vector<1x1x1xf32>
    %cst_38 = arith.constant 2.000000e+00 : f32
    %89 = arith.mulf %cst_38, %88 : f32
    %90 = arith.subf %83, %89 : f32
    %cst_39 = arith.constant 8.000000e+00 : f32
    %91 = arith.addf %90, %cst_39 : f32
    %c0_40 = arith.constant 0 : index
    %92 = memref.load %arg15[%c0_40] : memref<1xf32, #tpu.memory_space<smem>>
    memref.store %91, %arg15[%c0_40] : memref<1xf32, #tpu.memory_space<smem>>
    %cst_41 = arith.constant 9.99999971E-10 : f32
    %93 = vector.broadcast %cst_41 : f32 to vector<8x8xf32>
    %94 = arith.cmpf ogt, %76, %93 : vector<8x8xf32>
    %95 = arith.extui %94 : vector<8x8xi1> to vector<8x8xi32>
    %96 = arith.sitofp %95 : vector<8x8xi32> to vector<8x8xf32>
    %cst_42 = arith.constant 1.000000e+00 : f32
    %97 = vector.broadcast %cst_42 : f32 to vector<8x1xf32>
    %cst_43 = arith.constant 1.000000e+00 : f32
    %98 = vector.broadcast %cst_43 : f32 to vector<1x8xf32>
    %cst_44 = arith.constant dense<0.000000e+00> : vector<8x1xf32>
    %99 = tpu.matmul %96, %97, %cst_44 {dimension_numbers = #tpu.dot_dimension_numbers<[1], [0], [0], [1], [0, 0, 1, 1], [], []>} : vector<8x8xf32>, vector<8x1xf32>, vector<8x1xf32> -> vector<8x1xf32>
    %cst_45 = arith.constant 1.000000e+00 : f32
    %100 = vector.broadcast %cst_45 : f32 to vector<8x1xf32>
    %101 = arith.addf %99, %100 : vector<8x1xf32>
    %cst_46 = arith.constant dense<0.000000e+00> : vector<1x8xf32>
    %102 = tpu.matmul %98, %96, %cst_46 {dimension_numbers = #tpu.dot_dimension_numbers<[1], [0], [0], [1], [0, 0, 1, 1], [], []>} : vector<1x8xf32>, vector<8x8xf32>, vector<1x8xf32> -> vector<1x8xf32>
    %cst_47 = arith.constant 1.000000e+00 : f32
    %103 = vector.broadcast %cst_47 : f32 to vector<1x8xf32>
    %104 = arith.addf %102, %103 : vector<1x8xf32>
    %105 = math.rsqrt %101 : vector<8x1xf32>
    %106 = math.rsqrt %104 : vector<1x8xf32>
    %107 = vector.broadcast %105 : vector<8x1xf32> to vector<8x8xf32>
    %108 = arith.mulf %96, %107 : vector<8x8xf32>
    %109 = vector.broadcast %106 : vector<1x8xf32> to vector<8x8xf32>
    %110 = arith.mulf %108, %109 : vector<8x8xf32>
    %111 = arith.mulf %105, %105 : vector<8x1xf32>
    %c0_48 = arith.constant 0 : index
    %c0_49 = arith.constant 0 : index
    %112 = vector.load %arg7[%c0_48, %c0_49] : memref<32x32xf32, #tpu.memory_space<vmem>>, vector<32x32xf32>
    %cst_50 = arith.constant dense<0.000000e+00> : vector<8x32xf32>
    %113 = tpu.matmul %74, %112, %cst_50 {dimension_numbers = #tpu.dot_dimension_numbers<[1], [0], [0], [1], [0, 0, 1, 1], [], []>} : vector<8x32xf32>, vector<32x32xf32>, vector<8x32xf32> -> vector<8x32xf32>
    %cst_51 = arith.constant dense<0.000000e+00> : vector<8x32xf32>
    %114 = tpu.matmul %110, %113, %cst_51 {dimension_numbers = #tpu.dot_dimension_numbers<[1], [0], [0], [1], [0, 0, 1, 1], [], []>} : vector<8x8xf32>, vector<8x32xf32>, vector<8x32xf32> -> vector<8x32xf32>
    %115 = vector.broadcast %111 : vector<8x1xf32> to vector<8x32xf32>
    %116 = arith.mulf %115, %113 : vector<8x32xf32>
    %117 = arith.addf %114, %116 : vector<8x32xf32>
    %c0_52 = arith.constant 0 : index
    %c0_53 = arith.constant 0 : index
    %118 = vector.load %arg8[%c0_52, %c0_53] : memref<1x32xf32, #tpu.memory_space<vmem>>, vector<1x32xf32>
    %119 = vector.broadcast %118 : vector<1x32xf32> to vector<8x32xf32>
    %120 = arith.addf %117, %119 : vector<8x32xf32>
    %121 = math.tanh %120 : vector<8x32xf32>
    %c0_54 = arith.constant 0 : index
    %c0_55 = arith.constant 0 : index
    %122 = vector.load %arg9[%c0_54, %c0_55] : memref<32x32xf32, #tpu.memory_space<vmem>>, vector<32x32xf32>
    %cst_56 = arith.constant dense<0.000000e+00> : vector<8x32xf32>
    %123 = tpu.matmul %121, %122, %cst_56 {dimension_numbers = #tpu.dot_dimension_numbers<[1], [0], [0], [1], [0, 0, 1, 1], [], []>} : vector<8x32xf32>, vector<32x32xf32>, vector<8x32xf32> -> vector<8x32xf32>
    %cst_57 = arith.constant dense<0.000000e+00> : vector<8x32xf32>
    %124 = tpu.matmul %110, %123, %cst_57 {dimension_numbers = #tpu.dot_dimension_numbers<[1], [0], [0], [1], [0, 0, 1, 1], [], []>} : vector<8x8xf32>, vector<8x32xf32>, vector<8x32xf32> -> vector<8x32xf32>
    %125 = vector.broadcast %111 : vector<8x1xf32> to vector<8x32xf32>
    %126 = arith.mulf %125, %123 : vector<8x32xf32>
    %127 = arith.addf %124, %126 : vector<8x32xf32>
    %c0_58 = arith.constant 0 : index
    %c0_59 = arith.constant 0 : index
    %128 = vector.load %arg10[%c0_58, %c0_59] : memref<1x32xf32, #tpu.memory_space<vmem>>, vector<1x32xf32>
    %129 = vector.broadcast %128 : vector<1x32xf32> to vector<8x32xf32>
    %130 = arith.addf %127, %129 : vector<8x32xf32>
    %131 = math.tanh %130 : vector<8x32xf32>
    %c0_60 = arith.constant 0 : index
    %c0_61 = arith.constant 0 : index
    %132 = vector.load %arg11[%c0_60, %c0_61] : memref<32x8xf32, #tpu.memory_space<vmem>>, vector<32x8xf32>
    %cst_62 = arith.constant dense<0.000000e+00> : vector<8x8xf32>
    %133 = tpu.matmul %131, %132, %cst_62 {dimension_numbers = #tpu.dot_dimension_numbers<[1], [0], [0], [1], [0, 0, 1, 1], [], []>} : vector<8x32xf32>, vector<32x8xf32>, vector<8x8xf32> -> vector<8x8xf32>
    %cst_63 = arith.constant dense<0.000000e+00> : vector<8x8xf32>
    %134 = tpu.matmul %110, %133, %cst_63 {dimension_numbers = #tpu.dot_dimension_numbers<[1], [0], [0], [1], [0, 0, 1, 1], [], []>} : vector<8x8xf32>, vector<8x8xf32>, vector<8x8xf32> -> vector<8x8xf32>
    %135 = vector.broadcast %111 : vector<8x1xf32> to vector<8x8xf32>
    %136 = arith.mulf %135, %133 : vector<8x8xf32>
    %137 = arith.addf %134, %136 : vector<8x8xf32>
    %c0_64 = arith.constant 0 : index
    %c0_65 = arith.constant 0 : index
    %138 = vector.load %arg12[%c0_64, %c0_65] : memref<1x8xf32, #tpu.memory_space<vmem>>, vector<1x8xf32>
    %139 = vector.broadcast %138 : vector<1x8xf32> to vector<8x8xf32>
    %140 = arith.addf %137, %139 : vector<8x8xf32>
    %c0_66 = arith.constant 0 : index
    %c0_67 = arith.constant 0 : index
    %141 = vector.load %arg13[%c0_66, %c0_67] : memref<8x8xf32, #tpu.memory_space<vmem>>, vector<8x8xf32>
    tpu.vector_store %arg13[%c0_66, %c0_67], %140 {strides = array<i32>} : memref<8x8xf32, #tpu.memory_space<vmem>>, vector<8x8xf32>,
    return
  }
  func.func @transform_0(%arg0: i32) -> (i32, i32) {
    %c0_i32 = arith.constant 0 : i32
    %c0_i32_0 = arith.constant 0 : i32
    %c0_i32_1 = arith.constant 0 : i32
    return %c0_i32, %c0_i32_0 : i32, i32
  }
  func.func @transform_1(%arg0: i32) -> (i32, i32) {
    %c0_i32 = arith.constant 0 : i32
    %c0_i32_0 = arith.constant 0 : i32
    %c0_i32_1 = arith.constant 0 : i32
    return %c0_i32, %c0_i32_0 : i32, i32
  }
  func.func @transform_2(%arg0: i32) -> (i32, i32) {
    %c0_i32 = arith.constant 0 : i32
    %c0_i32_0 = arith.constant 0 : i32
    %c0_i32_1 = arith.constant 0 : i32
    return %c0_i32, %c0_i32_0 : i32, i32
  }
  func.func @transform_3(%arg0: i32) -> (i32, i32) {
    %c0_i32 = arith.constant 0 : i32
    %c0_i32_0 = arith.constant 0 : i32
    %c0_i32_1 = arith.constant 0 : i32
    return %c0_i32, %c0_i32_0 : i32, i32
  }
  func.func @transform_4(%arg0: i32) -> (i32, i32) {
    %c0_i32 = arith.constant 0 : i32
    %c0_i32_0 = arith.constant 0 : i32
    %c0_i32_1 = arith.constant 0 : i32
    return %c0_i32, %c0_i32_0 : i32, i32
  }
  func.func @transform_5(%arg0: i32) -> (i32, i32) {
    %c0_i32 = arith.constant 0 : i32
    %c0_i32_0 = arith.constant 0 : i32
    %c0_i32_1 = arith.constant 0 : i32
    return %c0_i32, %c0_i32_0 : i32, i32
  }
  func.func @transform_6(%arg0: i32) -> (i32, i32) {
    %c0_i32 = arith.constant 0 : i32
    %c0_i32_0 = arith.constant 0 : i32
    %c0_i32_1 = arith.constant 0 : i32
    return %c0_i32, %c0_i32_0 : i32, i32
  }
  func.func @transform_7(%arg0: i32) -> (i32, i32) {
    %c0_i32 = arith.constant 0 : i32
    %c0_i32_0 = arith.constant 0 : i32
    %c0_i32_1 = arith.constant 0 : i32
    return %c0_i32, %c0_i32_0 : i32, i32
  }
  func.func @transform_8(%arg0: i32) -> (i32, i32) {
    %c0_i32 = arith.constant 0 : i32
    %c0_i32_0 = arith.constant 0 : i32
    %c0_i32_1 = arith.constant 0 : i32
    return %c0_i32, %c0_i32_0 : i32, i32
  }
  func.func @transform_9(%arg0: i32) -> (i32, i32) {
    %c0_i32 = arith.constant 0 : i32
    %c0_i32_0 = arith.constant 0 : i32
    %c0_i32_1 = arith.constant 0 : i32
    return %c0_i32, %c0_i32_0 : i32, i32
  }
  func.func @transform_10(%arg0: i32) -> (i32, i32) {
    %c0_i32 = arith.constant 0 : i32
    %c0_i32_0 = arith.constant 0 : i32
    %c0_i32_1 = arith.constant 0 : i32
    return %c0_i32, %c0_i32_0 : i32, i32
  }
  func.func @transform_11(%arg0: i32) -> (i32, i32) {
    %c0_i32 = arith.constant 0 : i32
    %c0_i32_0 = arith.constant 0 : i32
    %c0_i32_1 = arith.constant 0 : i32
    return %c0_i32, %c0_i32_0 : i32, i32
  }
  func.func @transform_12(%arg0: i32) -> (i32, i32) {
    %c0_i32 = arith.constant 0 : i32
    %c0_i32_0 = arith.constant 0 : i32
    %c0_i32_1 = arith.constant 0 : i32
    return %c0_i32, %c0_i32_0 : i32, i32
  }
  func.func @transform_13(%arg0: i32) -> (i32, i32) {
    %c0_i32 = arith.constant 0 : i32
    %c0_i32_0 = arith.constant 0 : i32
    %c0_i32_1 = arith.constant 0 : i32
    return %c0_i32, %c0_i32_0 : i32, i32
  }
  func.func @transform_14(%arg0: i32) -> i32 {
    %c0_i32 = arith.constant 0 : i32
    %c0_i32_0 = arith.constant 0 : i32
    return %c0_i32 : i32
  }
}

</mosaic_0001>

<bundles_post_ra>
// kernel: capsule_pool_ae_forward.1
= control target key start
LH: loop header
LB: loop body
LE: loop exit
PB: predicated region body
PF: predicated region fallthrough
CT: control target
= control target key end

     0   :  { %20 = vsyncpa [#allocation3], 0  ;;  %s2909_s0 = inlined_call_operand.vmem [shape: f32[16,16], index: 0, kind: input, shape index: {}]   ;;  %s2910_s1 = inlined_call_operand.vmem [shape: f32[16,8], index: 1, kind: input, shape index: {}]   ;;  %s2911_s2 = inlined_call_operand.vmem [shape: f32[8,32], index: 2, kind: input, shape index: {}]   ;;  %s2912_s3 = inlined_call_operand.vmem [shape: f32[1,32], index: 3, kind: input, shape index: {}]   ;;  %s2913_s4 = inlined_call_operand.vmem [shape: f32[32,32], index: 4, kind: input, shape index: {}]   ;;  %s2914_s5 = inlined_call_operand.vmem [shape: f32[1,32], index: 5, kind: input, shape index: {}]   ;;  %s2915_s6 = inlined_call_operand.vmem [shape: f32[32,32], index: 6, kind: input, shape index: {}]   ;;  %s2916_s7 = inlined_call_operand.vmem [shape: f32[1,32], index: 7, kind: input, shape index: {}]   ;;  %s2917_s8 = inlined_call_operand.vmem [shape: f32[32,32], index: 8, kind: input, shape index: {}]   ;;  %s2918_s9 = inlined_call_operand.vmem [shape: f32[1,32], index: 9, kind: input, shape index: {}]   ;;  %s2919_s10 = inlined_call_operand.vmem [shape: f32[32,8], index: 10, kind: input, shape index: {}]   ;;  %s2920_s11 = inlined_call_operand.vmem [shape: f32[1,8], index: 11, kind: input, shape index: {}]   ;;  %s2921_s12 = inlined_call_operand.hbm [shape: f32[8,8], index: 12, kind: output, shape index: {0}]   ;;  %s2922_s13 = inlined_call_operand.hbm [shape: f32[8,8], index: 13, kind: output, shape index: {1}]   ;;  %s2923_s14 = inlined_call_operand.hbm [shape: f32[1], index: 14, kind: output, shape index: {2}]  }
   0x1   :  { %21 = vsyncpa [#allocation6], 0  ;;  %v2646_v0 = vld [vmem:[%s2909_s0] sm:$0xff]  ;;  %vm49_vm0 = vcmask 130048   ;;  %v2651_v1 = vld [vmem:[%s2909_s0 + $0x8] sm:$0xff] }
   0x2   :  { %v2559_v2 = vmov 1.0|1.0   ;;  %2223 = vmatprep.mubr.msk.f32.mxu0 %vm49_vm0, %v2646_v0  ;;  %v2394_v3 = vpack.c.bf16 %v2651_v1, %v2646_v0 }
   0x3   :  { %2391 = vmatprep.subr.bf16.mxu0 %v2559_v2 }
   0x4   :  { %22 = vsyncpa [#allocation4], 0  ;;  %2392 = vmatpush3.bf16.msra.mxu0 %v2559_v2  ;;  %v2560_v4 = vmov 0.0|0.0   ;;  %vm2561_vm1 = vmmov 0   ;;  %v2562_v5 = vmov 0.0   ;;  %v2563_v6 = vmov 1.0  }
   0x5   :  { %2393 = vmatprep.subr.bf16.mxu1 %v2560_v4  ;;  %2230 = vmatprep.mubr.msk.f32.mxu1 %vm2561_vm1, %v2562_v5  ;;  %v2564_v7 = vmov 0   ;;  %v227_v17 = vld [vmem:[%s2910_s1] sm:$0xff]  ;;  %v228_v18 = vld [vmem:[%s2910_s1 + $0x8] sm:$0xff]  ;;  %v219_v22 = vlaneseq  ;;  %vm330_vm2 = vcmask 64512   ;;  %v493_v53 = vld [vmem:[%s2913_s4 + $0x10] sm:$0xff]  ;;  %vm502_vm3 = vcmask 261120  }
   0x6   :  { %2395 = vmatpush3.bf16.msra.mxu1 %v2394_v3  ;;  %2471 = vset.pattern.permute.xlu0 %v2564_v7  ;;  %v2396_v19 = vpack.c.bf16 %v228_v18, %v227_v17  ;;  %v322_v33 = vld [vmem:[%s2911_s2] sm:$0xff]  ;;  %v492_v43 = vld [vmem:[%s2913_s4 + $0x8] sm:$0xff]  ;;  %v494_v54 = vld [vmem:[%s2913_s4 + $0x18] sm:$0xff] }
   0x7   :  { %2224 = vmatmul.mubr.msk.f32.vlgmr.msra.gmra.mrb[0].mxu0 %vm49_vm0, %v2651_v1  ;;  %2472 = vset.pattern.permute.xlu1 %v2564_v7  ;;  %v2673_v23 = vshrl.u32 %v219_v22, 7  ;;  %v491_v42 = vld [vmem:[%s2913_s4] sm:$0xff]  ;;  %v2408_v55 = vpack.c.bf16 %v494_v54, %v493_v53  ;;  %vm2418_vm4 = vmpackc.low %vm502_vm3, %vm502_vm3  ;;  %v1570_v53 = vld [vmem:[%s2915_s6 + $0x8] sm:$0xff] }
   0x8   :  { %2397 = vmatprep.subr.bf16.mxu0 %v2396_v19  ;;  %2240 = vmatprep.subr.mxu1 %v322_v33  ;;  %v2404_v44 = vpack.c.bf16 %v492_v43, %v491_v42  ;;  %v2094_v45 = vld [vmem:[%s2912_s3] ss:$0 sm:$0xff] }
   0x9   :  { %2231 = vmatmul.mubr.msk.f32.vlgmr.msra.gmra.mrb[0].mxu1 %vm49_vm0, %v2563_v6  ;;  %2399 = vmatpush3.bf16.msra.mxu0 %v2396_v19  ;;  %v2676_v24 = vsub.s32 0, %v2673_v23  ;;  %v2099_v62 = vld [vmem:[%s2914_s5] ss:$0 sm:$0xff]  ;;  %v743_v19 = vadd.s32 8, %v2673_v23 }
   0xa   :  { %2241 = vmatpush3.msra.mxu1 %v322_v33 }
   0xb   :  { %2405 = vmatprep.subr.bf16.mxu1 %v2404_v44 }
  0xda   :  { %v2225_v8 = vpop.f32.mrb[0].mxu0 }
  0xdb   :  { %v122_v9 = vpop.f32.mrb[1].mxu0  ;;  %v128_v11 = vadd.f32 1.0, %v2225_v8 }
  0xdc   :  { %v200_v10 = vpop.f32.mrb[0].mxu1  ;;  %v123_v12 = vadd.f32 1.0, %v122_v9 }
  0xdd   :  { %v2232_v13 = vpop.f32.mrb[1].mxu1  ;;  %v201_v21 = vadd.f32 1.0, %v200_v10 }
  0xde   :  { %2473 = vrsqrt.f32 %v123_v12 }
  0xdf   :  { %2475 = vrsqrt.f32 %v128_v11 }
  0xe0   :  { %2477 = vrsqrt.f32 %v201_v21 }
  0xe8   :  { %v2474_v14 = vpop.eup %2473 }
  0xe9   :  { %209 = vperm.xlu0 %2471, %v2474_v14   ;;  %v225_v15 = vmul.f32 %v2474_v14, %v2474_v14  ;;  %v2476_v16 = vpop.eup %2475 }
  0xea   :  { %v226_v20 = vmul.f32 %v2476_v16, %v2476_v16  ;;  %v2478_v25 = vpop.eup %2477 }
  0xeb   :  { %231 = vperm.xlu1 %2472, %v225_v15   ;;  %v222_v26 = vrot.slane %v2478_v25, %v2676_v24 }
  0xed   :  { %214 = vperm.xlu0 %2471, %v2476_v16  }
  0xef   :  { %236 = vperm.xlu1 %2472, %v226_v20   ;;  %v745_v20 = vand.u32 127, %v219_v22 }
  0xf1   :  { %vm765_vm5 = vcmp.lt.s32.totalorder %v743_v19, %v745_v20  ;;  %vm764_vm8 = vcmp.lt.s32.totalorder %v2673_v23, %v745_v20 }
 0x168   :  { %v210_v27 = vpop.permute.xlu0 %209 }
 0x169   :  { %v217_v28 = vmul.f32 %v210_v27, %v2646_v0 }
 0x16a   :  { %v232_v34 = vpop.permute.xlu1 %231 }
 0x16b   :  { %v223_v29 = vmul.f32 %v222_v26, %v217_v28  ;;  %v239_v36 = vmul.f32 %v232_v34, %v227_v17 }
 0x16c   :  { %v215_v30 = vpop.permute.xlu0 %214 }
 0x16d   :  { %v218_v31 = vmul.f32 %v215_v30, %v2651_v1  ;;  %2237 = vmatprep.mubr.msk.f32.mxu0 %vm49_vm0, %v223_v29 }
 0x16e   :  { %v237_v35 = vpop.permute.xlu1 %236 }
 0x16f   :  { %v224_v32 = vmul.f32 %v222_v26, %v218_v31  ;;  %v240_v38 = vmul.f32 %v237_v35, %v228_v18 }
 0x171   :  { %2238 = vmatmul.mubr.msk.f32.vlgmr.msra.gmra.mrb[2].mxu0 %vm49_vm0, %v224_v32 }
 0x172   :  { %2249 = vmatprep.mubr.msk.f32.mxu0 %vm49_vm0, %v223_v29 }
 0x244   :  { %v2239_v37 = vpop.f32.mrb[2].mxu0 }
 0x245   :  { %v313_v39 = vpop.f32.mrb[3].mxu0  ;;  %v319_v41 = vadd.f32 %v2239_v37, %v240_v38 }
 0x246   :  { %v314_v40 = vadd.f32 %v313_v39, %v239_v36 }
 0x248   :  { %2242 = vmatprep.mubr.msk.f32.mxu1 %vm330_vm2, %v314_v40 }
 0x249   :  { %2243 = vmatmul.mubr.msk.f32.vlgmr.msra.gmra.mrb[2].mxu1 %vm330_vm2, %v319_v41 }
 0x24a   :  { %2407 = vmatpush3.bf16.msra.mxu1 %v2404_v44 }
 0x24b   :  { %2409 = vmatprep.subr.bf16.mxu1 %v2408_v55 }
 0x24e   :  { %2411 = vmatpush3.bf16.msra.mxu1 %v2408_v55 }
 0x24f   :  { %2416 = vmatprep.subr.bf16.mxu1 %v2560_v4 }
 0x31c   :  { %v2244_v46 = vpop.f32.mrb[2].mxu1 }
 0x31d   :  { %v409_v47 = vadd.f32 %v2244_v46, %v2094_v45  ;;  %v403_v48 = vpop.f32.mrb[3].mxu1 }
 0x31e   :  { %v404_v49 = vadd.f32 %v2094_v45, %v403_v48 }
 0x31f   :  { %2479 = vtanh.f32 %v409_v47 }
 0x320   :  { %2481 = vtanh.f32 %v404_v49 }
 0x329   :  { %v2480_v50 = vpop.eup %2479 }
 0x32a   :  { %v2482_v51 = vpop.eup %2481  ;;  %v415_v56 = vmul.f32 %v2480_v50, %v237_v35 }
 0x32b   :  { %v2400_v52 = vpack.c.bf16 %v2480_v50, %v2482_v51  ;;  %v414_v58 = vmul.f32 %v2482_v51, %v232_v34 }
 0x32d   :  { %2401 = vmatprep.subr.bf16.mxu0 %v2400_v52 }
 0x32e   :  { %2403 = vmatpush3.bf16.msra.mxu0 %v2400_v52  ;;  %v1569_v52 = vld [vmem:[%s2915_s6] sm:$0xff] }
 0x32f   :  { %2412 = vmatprep.subr.bf16.mxu0 %v2559_v2  ;;  %v2439_v55 = vpack.c.bf16 %v1570_v53, %v1569_v52  ;;  %v2134_v53 = vld [vmem:[%s2918_s9] ss:$0 sm:$0xff] }
 0x331   :  { %2250 = vmatmul.mubr.msk.f32.vlgmr.msra.gmra.mrb[4].mxu0 %vm49_vm0, %v224_v32 }
 0x332   :  { %2413 = vmatpush3.bf16.msra.mxu0 %v2559_v2 }
 0x333   :  { %2414 = vmatprep.subr.bf16.mxu0 %v2559_v2 }
 0x336   :  { %2415 = vmatpush3.bf16.msra.mxu0 %v2559_v2 }
 0x337   :  { %2420 = vmatprep.subr.bf16.mxu0 %v2560_v4 }
 0x404   :  { %v2251_v57 = vpop.f32.mrb[4].mxu0 }
 0x405   :  { %v488_v59 = vadd.f32 %v2251_v57, %v415_v56  ;;  %v482_v60 = vpop.f32.mrb[5].mxu0  ;;  %v1571_v57 = vld [vmem:[%s2915_s6 + $0x10] sm:$0xff] }
 0x406   :  { %v483_v61 = vadd.f32 %v482_v60, %v414_v58  ;;  %v1572_v58 = vld [vmem:[%s2915_s6 + $0x18] sm:$0xff] }
 0x407   :  { %v2442_v60 = vpack.c.bf16 %v1572_v58, %v1571_v57 }
 0x408   :  { %2260 = vmatprep.mubr.msk.f32.mxu1 %vm502_vm3, %v483_v61 }
 0x409   :  { %2261 = vmatmul.mubr.msk.f32.vlgmr.msra.gmra.mrb[4].mxu1 %vm502_vm3, %v488_v59 }
 0x40a   :  { %2278 = vmatprep.mubr.msk.f32.mxu1 %vm2561_vm1, %v2562_v5 }
 0x4dc   :  { %v2262_v63 = vpop.f32.mrb[4].mxu1 }
 0x4dd   :  { %v581_v3 = vadd.f32 %v2262_v63, %v2099_v62  ;;  %v575_v7 = vpop.f32.mrb[5].mxu1 }
 0x4de   :  { %v576_v8 = vadd.f32 %v2099_v62, %v575_v7 }
 0x4df   :  { %2483 = vtanh.f32 %v581_v3 }
 0x4e0   :  { %2485 = vtanh.f32 %v576_v8 }
 0x4e9   :  { %v2484_v9 = vpop.eup %2483 }
 0x4ea   :  { %v2486_v10 = vpop.eup %2485  ;;  %v587_v11 = vmul.f32 %v2484_v9, %v2484_v9 }
 0x4eb   :  { %v586_v12 = vmul.f32 %v2486_v10, %v2486_v10  ;;  %v2718_v13 = vpack.c.bf16 %v2484_v9, %v2486_v10 }
 0x4ed   :  { %2271 = vmatprep.mubr.msk.f32.mxu0 %vm502_vm3, %v586_v12  ;;  %v2417_v14 = vpack.c.bf16 %v587_v11, %v586_v12 }
 0x4ee   :  { %2272 = vmatmul.mubr.msk.f32.vlgmr.msra.gmra.mrb[6].mxu0 %vm502_vm3, %v587_v11 }
 0x4ef   :  { %2419 = vmatpush3.bf16.xpose.msk.msra.mxu1 %vm2418_vm4, %v2417_v14  ;;  %2285 = vmatprep.mubr.msk.f32.mxu0 %vm2561_vm1, %v2562_v5 }
 0x4f0   :  { %2426 = vmatprep.subr.bf16.mxu1 %v2560_v4 }
 0x4f6   :  { %2279 = vmatmul.mubr.msk.f32.vlgmr.msra.gmra.mrb[6].mxu1 %vm502_vm3, %v2563_v6 }
 0x4f7   :  { %2429 = vmatpush3.bf16.xpose.msk.msra.mxu1 %vm2418_vm4, %v2718_v13  ;;  %2299 = vmatprep.mubr.msk.f32.mxu1 %vm2561_vm1, %v2562_v5 }
 0x5c1   :  { %v2273_v15 = vpop.f32.mrb[6].mxu0 }
 0x5c2   :  { %753 = vperm.xlu1 %2472, %v2273_v15   ;;  %v660_v16 = vpop.f32.mrb[7].mxu0 }
 0x5c3   :  { %748 = vperm.xlu0 %2471, %v660_v16  }
 0x5c9   :  { %v737_v17 = vpop.f32.mrb[6].mxu1 }
 0x5ca   :  { %v2280_v18 = vpop.f32.mrb[7].mxu1  ;;  %v759_v21 = vrot.slane %v737_v17, %v2676_v24 }
 0x641   :  { %v754_v25 = vpop.permute.xlu1 %753 }
 0x642   :  { %vm761_vm6 = vcmp.gt.f32.partialorder %v754_v25, %v759_v21  ;;  %vm763_vm7 = vcmp.eq.f32.partialorder %v754_v25, %v759_v21  ;;  %v749_v26 = vpop.permute.xlu0 %748 }
 0x643   :  { %vm767_vm9 = vmand %vm763_vm7, %vm765_vm5  ;;  %vm760_vm10 = vcmp.gt.f32.partialorder %v749_v26, %v759_v21  ;;  %vm762_vm11 = vcmp.eq.f32.partialorder %v749_v26, %v759_v21 }
 0x644   :  { %vm769_vm12 = vmor %vm761_vm6, %vm767_vm9 }
 0x645   :  { %vm766_vm13 = vmand %vm762_vm11, %vm764_vm8 }
 0x646   :  { %vm768_vm14 = vmor %vm760_vm10, %vm766_vm13 }
 0x647   :  { %vm2421_vm15 = vmpackc.low %vm769_vm12, %vm768_vm14 }
 0x648   :  { %2422 = vmatpush3.bf16.msk.msra.mxu0 %vm2421_vm15, %v2559_v2 }
 0x649   :  { %2423 = vmatprep.subr.bf16.mxu0 %v2560_v4 }
 0x64b   :  { %2286 = vmatmul.mubr.msk.f32.vlgmr.msra.gmra.mrb[8].mxu0 %vm49_vm0, %v2563_v6 }
 0x64c   :  { %2425 = vmatpush3.bf16.msra.mxu0 %v2718_v13  ;;  %2292 = vmatprep.mubr.msk.f32.mxu0 %vm2561_vm1, %v2562_v5 }
 0x64d   :  { %2430 = vmatprep.subr.bf16.mxu0 %v2560_v4 }
 0x71e   :  { %v840_v22 = vpop.f32.mrb[8].mxu0 }
 0x71f   :  { %v2456_v27 = vtrunc.f32 %v840_v22  ;;  %v2287_v28 = vpop.f32.mrb[9].mxu0 }
 0x721   :  { %v2457_v29 = vcvt.f32.s32 %v2456_v27 }
 0x723   :  { %v848_v30 = vrot.slane %v2457_v29, %v2676_v24 }
 0x725   :  { %vm849_vm4 = vcmp.eq.s32.totalorder %v848_v30, %v2673_v23 }
 0x726   :  { %v2112_v31 = vsel %vm849_vm4, 1.0, %v2562_v5 }
 0x727   :  { %2293 = vmatmul.mubr.msk.f32.vlgmr.msra.gmra.mrb[10].mxu0 %vm49_vm0, %v2112_v31 }
 0x728   :  { %2431 = vmatpush3.bf16.msra.mxu0 %v2559_v2  ;;  %2306 = vmatprep.mubr.msk.f32.mxu0 %vm2561_vm1, %v2562_v5 }
 0x729   :  { %2432 = vmatprep.subr.bf16.mxu0 %v2560_v4 }
 0x7fa   :  { %v921_v32 = vpop.f32.mrb[10].mxu0 }
 0x7fb   :  { %v2294_v33 = vpop.f32.mrb[11].mxu0  ;;  %2300 = vmatmul.mubr.msk.f32.vlgmr.msra.gmra.mrb[8].mxu1 %vm502_vm3, %v921_v32 }
 0x7fc   :  { %2318 = vmatprep.mubr.msk.f32.mxu1 %vm49_vm0, %v2646_v0 }
 0x8ce   :  { %v1000_v34 = vpop.f32.mrb[8].mxu1 }
 0x8cf   :  { %v1004_v23 = vmul.f32 0.17677669, %v1000_v34  ;;  %v2301_v35 = vpop.f32.mrb[9].mxu1 }
 0x8d0   :  { %v1735_v35 = vld [vmem:[%s2917_s8 + $0x8] sm:$0xff] }
 0x8d1   :  { %v1005_v36 = vsel %vm49_vm0, %v1004_v23, -inf }
 0x8d2   :  { %1006 = vmax.xlane.f32.xlu0 %v1005_v36  ;;  %v1736_v36 = vld [vmem:[%s2917_s8 + $0x10] sm:$0xff] }
 0x95f   :  { %v1007_v37 = vpop.xlane.xlu0 %1006 }
 0x960   :  { %v1008_v2 = vsub.f32 %v1004_v23, %v1007_v37  ;;  %v1734_v23 = vld [vmem:[%s2917_s8] sm:$0xff] }
 0x961   :  { %v2445_v37 = vpack.c.bf16 %v1735_v35, %v1734_v23 }
 0x962   :  { %v1009_v38 = vmul.f32 1.442695, %v1008_v2  ;;  %v1737_v2 = vld [vmem:[%s2917_s8 + $0x18] sm:$0xff] }
 0x964   :  { %2487 = vpow2.f32 %v1009_v38  ;;  %v2448_v38 = vpack.c.bf16 %v1737_v2, %v1736_v36 }
 0x96e   :  { %v2488_v39 = vpop.eup %2487 }
 0x96f   :  { %2307 = vmatmul.mubr.msk.f32.vlgmr.msra.gmra.mrb[12].mxu0 %vm49_vm0, %v2488_v39 }
 0x970   :  { %2434 = vmatpush3.bf16.msra.mxu0 %v2718_v13  ;;  %2313 = vmatprep.mubr.msk.f32.mxu0 %vm2561_vm1, %v2562_v5 }
 0x971   :  { %2435 = vmatprep.subr.bf16.mxu0 %v2560_v4 }
 0xa42   :  { %v1080_v0 = vpop.f32.mrb[12].mxu0 }
 0xa43   :  { %1086 = vperm.xlu1 %2472, %v1080_v0   ;;  %v2308_v40 = vpop.f32.mrb[13].mxu0 }
 0xa44   :  { %v2131_v40 = vld [vmem:[%s2916_s7] ss:$0 sm:$0xff] }
 0xac2   :  { %v1087_v41 = vpop.permute.xlu1 %1086 }
 0xac3   :  { %2489 = vrcp.f32 %v1087_v41 }
 0xacd   :  { %v2490_v42 = vpop.eup %2489 }
 0xace   :  { %v1090_v43 = vmul.f32 %v2490_v42, %v2488_v39 }
 0xad0   :  { %2314 = vmatmul.mubr.msk.f32.vlgmr.msra.gmra.mrb[14].mxu0 %vm49_vm0, %v1090_v43  ;;  %2316 = vmatprep.subr.msk.mxu1 %vm49_vm0, %v1090_v43  ;;  %v1391_v44 = vmul.f32 %v1090_v43, %v1090_v43 }
 0xad1   :  { %2317 = vmatpush3.xpose.msk.msra.mxu1 %vm49_vm0, %v1090_v43  ;;  %2325 = vmatprep.mubr.msk.f32.mxu0 %vm2561_vm1, %v2562_v5 }
 0xad2   :  { %v1392_v45 = vsel %vm49_vm0, %v1391_v44, 0.0  ;;  %2328 = vmatprep.subr.mxu1 %v2562_v5 }
 0xad3   :  { %1393 = vadd.xlane.f32.xlu0 %v1392_v45 }
 0xad4   :  { %2319 = vmatmul.mubr.msk.f32.vlgmr.msra.gmra.mrb[10].mxu1 %vm49_vm0, %v2651_v1 }
 0xad5   :  { %2329 = vmatpush3.xpose.msk.msra.mxu1 %vm49_vm0, %v1090_v43  ;;  %2330 = vmatprep.mubr.msk.f32.mxu1 %vm2561_vm1, %v2562_v5 }
 0xad6   :  { %2338 = vmatprep.subr.mxu1 %v2562_v5 }
 0xad8   :  { %2331 = vmatmul.mubr.msk.f32.vlgmr.msra.gmra.mrb[12].mxu1 %vm49_vm0, %v1090_v43 }
 0xad9   :  { %2340 = vmatprep.mubr.msk.f32.mxu1 %vm2561_vm1, %v2562_v5 }
 0xb60   :  { %v1394_v19 = vpop.xlane.xlu0 %1393 }
 0xb61   :  { %v1395_v20 = vrot.slane %v1394_v19, 4 }
 0xb63   :  { %v1396_v21 = vadd.f32 %v1395_v20, %v1394_v19 }
 0xb65   :  { %v1397_v26 = vrot.slane %v1396_v21, 2 }
 0xba3   :  { %v1160_v46 = vpop.f32.mrb[14].mxu0 }
 0xba4   :  { %v2315_v47 = vpop.f32.mrb[15].mxu0 }
 0xba5   :  { %v1891_v47 = vld [vmem:[%s2919_s10] sm:$0xff] }
 0xba7   :  { %v2320_v48 = vpop.f32.mrb[10].mxu1 }
 0xba8   :  { %v1230_v49 = vpop.f32.mrb[11].mxu1 }
 0xba9   :  { %v2436_v50 = vpack.c.bf16 %v2320_v48, %v1230_v49  ;;  %v1892_v48 = vld [vmem:[%s2919_s10 + $0x8] sm:$0xff]  ;;  %v1893_v49 = vld [vmem:[%s2919_s10 + $0x10] sm:$0xff] }
 0xbab   :  { %2437 = vmatpush3.bf16.msra.mxu0 %v2436_v50  ;;  %v1376_v51 = vpop.f32.mrb[12].mxu1  ;;  %v2451_v50 = vpack.c.bf16 %v1892_v48, %v1891_v47 }
 0xbac   :  { %v2332_v1 = vpop.f32.mrb[13].mxu1  ;;  %2333 = vmatprep.subr.mxu0 %v2562_v5  ;;  %v1380_v11 = vmul.f32 %v1376_v51, %v1376_v51  ;;  %v1894_v51 = vld [vmem:[%s2919_s10 + $0x18] sm:$0xff]  ;;  %s2565_s10 = smov [#allocation5]  }
 0xbad   :  { %v2454_v1 = vpack.c.bf16 %v1894_v51, %v1893_v49  ;;  %s2064_s6 = sshll.u32 %s2565_s10, 4  ;;  %s2065_s6 = int_to_ptr.vmem [resolvable:$true] %s2064_s6 }
 0xbae   :  { %2326 = vmatmul.mubr.msk.f32.vlgmr.msra.gmra.mrb[16].mxu0 %vm49_vm0, %v1090_v43  ;;  %v1381_v12 = vsel %vm330_vm2, %v1380_v11, 0.0  ;;  %s2499_s1 = scalar_lea.vmem %s2065_s6, 128  ;;  %p2504_p1 = scmp.lt.s32.totalorder %s2065_s6, %s2065_s6 }
 0xbaf   :  { %2334 = vmatpush3.msra.mxu0 %v2563_v6  ;;  %2335 = vmatprep.mubr.msk.f32.mxu0 %vm2561_vm1, %v2562_v5  ;;  %p2500_p0 = scmp.ne.s32.totalorder %s2065_s6, %s2499_s1  ;;  %p2505_p2 = scmp.lt.s32.totalorder %s2499_s1, %s2499_s1 }
 0xbb0   :  { %2438 = vmatprep.subr.bf16.mxu0 %v2560_v4 }
 0xbb1   :  { %p2506_p3 = por %p2505_p2, %p2504_p1 }
 0xbb3   :  { %p2507_p4 = pnand %p2506_p3, %p2500_p0 }
 0xc81   :  { %v1305_v54 = vpop.f32.mrb[16].mxu0 }
 0xc82   :  { %vm1407_vm5 = vcmp.gt.f32.partialorder %v1305_v54, 1e-09  ;;  %1309 = vst.msk [vmem:[#allocation5] sm:$0xff] %vm330_vm2, %v1305_v54  ;;  %v2327_v56 = vpop.f32.mrb[17].mxu0 }
 0xc83   :  { %v2125_v59 = vsel %vm1407_vm5, 1.0, %v2562_v5  ;;  %2339 = vmatpush3.msk.msra.mxu1 %vm1407_vm5, %v2563_v6 }
 0xc84   :  { %2336 = vmatmul.mubr.msk.f32.vlgmr.msra.gmra.mrb[18].mxu0 %vm330_vm2, %v2125_v59  ;;  %2341 = vmatmul.mubr.msk.f32.vlgmr.msra.gmra.mrb[14].mxu1 %vm330_vm2, %v2563_v6 }
 0xc85   :  { %2440 = vmatpush3.bf16.msra.mxu0 %v2439_v55  ;;  %2351 = vmatprep.mubr.msk.f32.mxu0 %vm2561_vm1, %v2562_v5 }
 0xc86   :  { %2441 = vmatprep.subr.bf16.mxu0 %v2560_v4  ;;  %2354 = vmatprep.subr.mxu1 %v2562_v5 }
 0xc87   :  { %2356 = vmatprep.mubr.msk.f32.mxu1 %vm2561_vm1, %v2562_v5 }
 0xc89   :  { %2443 = vmatpush3.bf16.msra.mxu0 %v2442_v60 }
 0xc8a   :  { %2370 = vmatprep.subr.mxu0 %v2562_v5 }
 0xc8c   :  { %2352 = vmatmul.mubr.msk.f32.vlgmr.msra.gmra.mrb[20].mxu0 %vm502_vm3, %v1160_v46 }
 0xc8d   :  { %2372 = vmatprep.mubr.msk.f32.mxu0 %vm2561_vm1, %v2562_v5 }
 0xd57   :  { %v1479_v6 = vpop.f32.mrb[18].mxu0  ;;  %v1551_v61 = vpop.f32.mrb[14].mxu1 }
 0xd58   :  { %v1480_v62 = vadd.f32 1.0, %v1479_v6  ;;  %v2337_v63 = vpop.f32.mrb[19].mxu0  ;;  %v2342_v3 = vpop.f32.mrb[15].mxu1  ;;  %v1552_v13 = vadd.f32 1.0, %v1551_v61 }
 0xd5a   :  { %2491 = vrsqrt.f32 %v1480_v62 }
 0xd5b   :  { %2493 = vrsqrt.f32 %v1552_v13 }
 0xd5f   :  { %v1642_v7 = vpop.f32.mrb[20].mxu0 }
 0xd60   :  { %v2353_v8 = vpop.f32.mrb[21].mxu0  ;;  %2355 = vmatpush3.msra.mxu1 %v1642_v7 }
 0xd61   :  { %2444 = vmatprep.subr.bf16.mxu1 %v2560_v4 }
 0xd64   :  { %v2492_v9 = vpop.eup %2491 }
 0xd65   :  { %1559 = vperm.xlu1 %2472, %v2492_v9   ;;  %v1568_v10 = vmul.f32 %v2492_v9, %v2492_v9  ;;  %v2494_v14 = vpop.eup %2493 }
 0xd66   :  { %v1566_v15 = vrot.slane %v2494_v14, %v2676_v24  ;;  %v1398_v24 = vadd.f32 %v1397_v26, %v1396_v21 }
 0xd68   :  { %v1399_v31 = vrot.slane %v1398_v24, 1 }
 0xd69   :  { %1648 = vperm.xlu1 %2472, %v1568_v10  }
 0xd6a   :  { %v1400_v34 = vadd.f32 %v1399_v31, %v1398_v24 }
 0xd8d   :  { %1382 = vadd.xlane.f32.xlu1 %v1381_v12 }
 0xde4   :  { %v1560_v16 = vpop.permute.xlu1 %1559 }
 0xde5   :  { %v1562_v17 = vmul.f32 %v2125_v59, %v1560_v16 }
 0xde7   :  { %v2814_v18 = vmul.f32 %v1566_v15, %v1562_v17 }
 0xde8   :  { %v2820_v25 = vpop.permute.xlu1 %1648 }
 0xde9   :  { %2357 = vmatmul.mubr.msk.f32.vlgmr.msra.gmra.mrb[16].mxu1 %vm330_vm2, %v2814_v18  ;;  %v1651_v39 = vmul.f32 %v2820_v25, %v1642_v7 }
 0xdea   :  { %2367 = vmatprep.mubr.msk.f32.mxu1 %vm2561_vm1, %v2562_v5  ;;  %2446 = vmatpush3.bf16.msra.mxu1 %v2445_v37 }
 0xdeb   :  { %2447 = vmatprep.subr.bf16.mxu1 %v2560_v4 }
 0xdee   :  { %2449 = vmatpush3.bf16.msra.mxu1 %v2448_v38 }
 0xdef   :  { %2386 = vmatprep.subr.mxu1 %v2562_v5 }
 0xe1a   :  { %v1383_v22 = vpop.xlane.xlu1 %1382 }
 0xe1b   :  { %v1384_v27 = vrot.slane %v1383_v22, 4 }
 0xe1d   :  { %v1385_v28 = vadd.f32 %v1384_v27, %v1383_v22 }
 0xe1f   :  { %v1386_v29 = vrot.slane %v1385_v28, 2 }
 0xe21   :  { %v1387_v30 = vadd.f32 %v1386_v29, %v1385_v28 }
 0xe23   :  { %v1388_v32 = vrot.slane %v1387_v30, 1 }
 0xe25   :  { %v1389_v33 = vadd.f32 %v1388_v32, %v1387_v30 }
 0xe27   :  { %2458 = vpush %v1389_v33 }
 0xe28   :  { %2460 = vpush %v1400_v34 }
 0xe58   :  { %s2459_s25 = spop %2458 }
 0xe59   :  { %s2461_s3 = spop %2460 }
 0xe5a   :  { %s1402_s26 = smul.f32 2.0, %s2461_s3 }
 0xe5c   :  { %s1403_s27 = ssub.f32 %s2459_s25, %s1402_s26 }
 0xe5e   :  { %s1404_s28 = sadd.f32 8.0, %s1403_s27 }
 0xe60   :  { %1406 = sst [smem:[#allocation7]] %s1404_s28 }
 0xebc   :  { %v1721_v0 = vpop.f32.mrb[16].mxu1 }
 0xebd   :  { %v1722_v41 = vadd.f32 %v1721_v0, %v1651_v39  ;;  %v2358_v42 = vpop.f32.mrb[17].mxu1 }
 0xebf   :  { %v1732_v43 = vadd.f32 %v2131_v40, %v1722_v41 }
 0xec1   :  { %2495 = vtanh.f32 %v1732_v43 }
 0xecb   :  { %v2496_v44 = vpop.eup %2495 }
 0xecc   :  { %2368 = vmatmul.mubr.msk.f32.vlgmr.msra.gmra.mrb[18].mxu1 %vm502_vm3, %v2496_v44 }
 0xecd   :  { %2388 = vmatprep.mubr.msk.f32.mxu1 %vm2561_vm1, %v2562_v5 }
 0xf9f   :  { %v1807_v45 = vpop.f32.mrb[18].mxu1 }
 0xfa0   :  { %v2369_v46 = vpop.f32.mrb[19].mxu1  ;;  %2371 = vmatpush3.msra.mxu0 %v1807_v45 }
 0xfa1   :  { %2373 = vmatmul.mubr.msk.f32.vlgmr.msra.gmra.mrb[22].mxu0 %vm330_vm2, %v2814_v18  ;;  %2450 = vmatprep.subr.bf16.mxu0 %v2560_v4 }
 0xfa2   :  { %2383 = vmatprep.mubr.msk.f32.mxu0 %vm2561_vm1, %v2562_v5  ;;  %2452 = vmatpush3.bf16.msra.mxu0 %v2451_v50  ;;  %v1811_v5 = vmul.f32 %v1807_v45, %v2820_v25 }
 0xfa3   :  { %2453 = vmatprep.subr.bf16.mxu0 %v2560_v4 }
 0xfa6   :  { %2455 = vmatpush3.bf16.msra.mxu0 %v2454_v1 }
0x1074   :  { %v1878_v52 = vpop.f32.mrb[22].mxu0 }
0x1075   :  { %v1879_v54 = vadd.f32 %v1878_v52, %v1811_v5  ;;  %v2374_v55 = vpop.f32.mrb[23].mxu0 }
0x1077   :  { %v1889_v56 = vadd.f32 %v2134_v53, %v1879_v54 }
0x1079   :  { %2497 = vtanh.f32 %v1889_v56 }
0x1083   :  { %v2498_v57 = vpop.eup %2497 }
0x1084   :  { %2384 = vmatmul.mubr.msk.f32.vlgmr.msra.gmra.mrb[24].mxu0 %vm502_vm3, %v2498_v57 }
0x1157   :  { %v1964_v58 = vpop.f32.mrb[24].mxu0 }
0x1158   :  { %v2385_v59 = vpop.f32.mrb[25].mxu0  ;;  %2387 = vmatpush3.msra.mxu1 %v1964_v58 }
0x1159   :  { %2389 = vmatmul.mubr.msk.f32.vlgmr.msra.gmra.mrb[20].mxu1 %vm330_vm2, %v2814_v18 }
0x115a   :  { %2510 = shalt.err (!%p2507_p4)
}
0x115b   :  { %s2511_s21 = scalar_lea.hbm %s2922_s13, 128 }
0x115c   :  { %p2512_p5 = scmp.ne.s32.totalorder %s2922_s13, %s2511_s21  ;;  %p2515_p6 = scmp.lt.u32.totalorder %s2511_s21, %s2922_s13 }
0x115e   :  { %p2517_p7 = pnand %p2515_p6, %p2512_p5 }
0x1160   :  { %2520 = shalt.err (!%p2517_p7)
}
0x1161   :  { %2067 = dma.vmem_to_hbm [thread:$0]  %s2065_s6, 128, %s2922_s13, [#allocation6]  }
0x1162   :  { %s2521_s28 = scalar_lea.hbm %s2923_s14, 16 }
0x1163   :  { %p2522_p8 = scmp.ne.s32.totalorder %s2923_s14, %s2521_s28  ;;  %p2525_p9 = scmp.lt.u32.totalorder %s2521_s28, %s2923_s14 }
0x1165   :  { %p2527_p10 = pnand %p2525_p9, %p2522_p8 }
0x1167   :  { %2530 = shalt.err (!%p2527_p10)
}
0x1168   :  { %s2566_s5 = smov [#allocation7]   ;;  %v1968_v4 = vmul.f32 %v1964_v58, %v2820_v25  ;;  %v2137_v6 = vld [vmem:[%s2920_s11] ss:$0 sm:$0xff]  ;;  %s2567_s0 = smov [#allocation2]  }
0x1169   :  { %2075 = dma.smem_to_hbm %s2566_s5, 16, %s2923_s14, [#allocation4]  }
0x116a   :  { %s2054_s17 = sshll.u32 %s2567_s0, 4  ;;  %s2055_s17 = int_to_ptr.vmem [resolvable:$true] %s2054_s17 }
0x116b   :  { %s2531_s18 = scalar_lea.vmem %s2055_s17, 128  ;;  %p2536_p12 = scmp.lt.s32.totalorder %s2055_s17, %s2055_s17 }
0x116c   :  { %p2532_p11 = scmp.ne.s32.totalorder %s2055_s17, %s2531_s18  ;;  %p2537_p13 = scmp.lt.s32.totalorder %s2531_s18, %s2531_s18 }
0x116e   :  { %p2538_p0 = por %p2537_p13, %p2536_p12 }
0x1170   :  { %p2539_p1 = pnand %p2538_p0, %p2532_p11 }
0x122c   :  { %v2035_v60 = vpop.f32.mrb[20].mxu1 }
0x122d   :  { %v2036_v61 = vadd.f32 %v2035_v60, %v1968_v4  ;;  %v2390_v62 = vpop.f32.mrb[21].mxu1 }
0x122f   :  { %v2046_v63 = vadd.f32 %v2137_v6, %v2036_v61 }
0x1231   :  { %2047 = vst.msk [vmem:[#allocation2] sm:$0xff] %vm330_vm2, %v2046_v63 }
0x1232   :  { %2542 = shalt.err (!%p2539_p1)
}
0x1233   :  { %s2543_s10 = scalar_lea.hbm %s2921_s12, 128 }
0x1234   :  { %p2544_p2 = scmp.ne.s32.totalorder %s2921_s12, %s2543_s10  ;;  %p2547_p3 = scmp.lt.u32.totalorder %s2543_s10, %s2921_s12 }
0x1236   :  { %p2549_p4 = pnand %p2547_p3, %p2544_p2 }
0x1238   :  { %2552 = shalt.err (!%p2549_p4)
}
0x1239   :  { %2057 = dma.vmem_to_hbm [thread:$0]  %s2055_s17, 128, %s2921_s12, [#allocation3]  }
0x123a   :  { %2553 = dma.done.wait [#allocation3], 128  }
0x123b   :  { %2554 = vsyncadd [#allocation3], 4294967168 }
0x123c   :  { %2555 = dma.done.wait [#allocation6], 128  }
0x123d   :  { %2556 = vsyncadd [#allocation6], 4294967168 }
0x123e   :  { %2557 = dma.done.wait [#allocation4], 16  }
0x123f   :  { %2558 = vsyncadd [#allocation4], 4294967280 }
0x1240   :  { %2085 = sfence }
0x1241   :  { %2086 = vsyncpa [#allocation3], 1 }
0x1242   :  { %2087 = vsyncpa [#allocation6], 1 }
0x1243   :  { %2088 = vsyncpa [#allocation4], 1 }

</bundles_post_ra>
